<compile_context>
chip_gen: v7x
topology: tpu7x:2x2x1
jax: 0.10.0
libtpu: 0.0.40
codegen_flags: <defaults>
</compile_context>

<pallas_src>
import functools

import jax
import jax.numpy as jnp
from jax.experimental import pallas as pl
from jax.experimental.pallas import tpu as pltpu

LANE = 128       # feature dims padded to a full lane width (unmasked stores)
KPAD = 32        # im2col contraction dim 9*C_in = 27 padded to a sublane multiple
VPAD = 128       # vocab padded to a full lane width for the one-hot gather matmul
GATE_PAD = 128   # each LSTM gate gets its own 128-lane block (aligned slices)


# ----------------------------------------------------------------------------
# The single fused Pallas kernel
# ----------------------------------------------------------------------------
def _fused_multimodal_kernel(ids_ref, patches_ref, img_pool_ref, txt_pool_ref,
                             w_conv_ref, b_conv_ref, w_img_fc_ref, b_img_fc_ref,
                             emb_ref, w_ih_ref, b_lstm_ref,
                             w_txt_fc_ref, b_txt_fc_ref,
                             w_fc_img_ref, w_fc_txt_ref, b_fc_ref,
                             o_ref, *, gate_pad):
    # ---------------- image branch: conv3x3-as-matmul + ReLU + GAP + FC -------
    # (B*HW, KPAD) @ (KPAD, C_PAD) -> f32 conv activations for the whole batch.
    conv = jnp.dot(patches_ref[...], w_conv_ref[...],
                   preferred_element_type=jnp.float32)
    conv = jnp.maximum(conv + b_conv_ref[...], 0.0)              # (B*HW, C_PAD)

    # Global average pool as one MXU matmul with a precomputed block-pool
    # matrix (1/HW already folded into its entries at init time).
    pooled = jnp.dot(img_pool_ref[...], conv.astype(jnp.bfloat16),
                     preferred_element_type=jnp.float32)         # (B, C_PAD)

    # Replaced resnet `model.fc`: (B, C_PAD) @ (C_PAD, F_PAD) + bias.
    img = jnp.dot(pooled.astype(jnp.bfloat16), w_img_fc_ref[...],
                  preferred_element_type=jnp.float32) + b_img_fc_ref[...]

    # ---------------- text branch: EmbeddingBag(mean) as one-hot MXU gather ---
    ids = ids_ref[...]                                           # (B*L, 1) int32
    vocab_iota = jax.lax.broadcasted_iota(
        jnp.int32, (ids.shape[0], emb_ref.shape[0]), 1)          # (B*L, V_PAD)
    onehot = jnp.where(vocab_iota == ids, 1.0, 0.0).astype(jnp.bfloat16)
    rows = jnp.dot(onehot, emb_ref[...],
                   preferred_element_type=jnp.float32)           # (B*L, E) gathered rows
    bag = jnp.dot(txt_pool_ref[...], rows.astype(jnp.bfloat16),
                  preferred_element_type=jnp.float32)            # (B, E) mean over L

    # Single-step LSTM from the zero initial state: h0 @ W_hh == 0 and
    # f * c0 == 0, so the recurrent matmul and the forget-gate term vanish.
    # Gates (i, f, g, o) each live in their own 128-lane block -> aligned slices.
    gates = jnp.dot(bag.astype(jnp.bfloat16), w_ih_ref[...],
                    preferred_element_type=jnp.float32) + b_lstm_ref[...]
    i_gate = jax.nn.sigmoid(gates[:, 0 * gate_pad:1 * gate_pad])
    g_gate = jnp.tanh(gates[:, 2 * gate_pad:3 * gate_pad])
    o_gate = jax.nn.sigmoid(gates[:, 3 * gate_pad:4 * gate_pad])
    c = i_gate * g_gate
    h = o_gate * jnp.tanh(c)                                     # (B, 128); pad cols are 0

    # Text FC: (B, 128) @ (128, F_PAD) + bias.
    txt = jnp.dot(h.astype(jnp.bfloat16), w_txt_fc_ref[...],
                  preferred_element_type=jnp.float32) + b_txt_fc_ref[...]

    # ---------------- fusion head: concat + Linear, split over the concat -----
    # concat([img, txt]) @ [W_img; W_txt] + b == img@W_img + txt@W_txt + b.
    out = (jnp.dot(img.astype(jnp.bfloat16), w_fc_img_ref[...],
                   preferred_element_type=jnp.float32)
           + jnp.dot(txt.astype(jnp.bfloat16), w_fc_txt_ref[...],
                     preferred_element_type=jnp.float32)
           + b_fc_ref[...])
    o_ref[...] = out.astype(o_ref.dtype)


def fused_multimodal_pallas(ids, patches, params):
    B = params["img_pool"].shape[0]
    ncp = params["w_fc_img"].shape[1]
    gate_pad = params["w_ih"].shape[1] // 4
    operands = (ids, patches, params["img_pool"], params["txt_pool"],
                params["w_conv"], params["b_conv"],
                params["w_img_fc"], params["b_img_fc"],
                params["embedding"], params["w_ih"], params["b_lstm"],
                params["w_txt_fc"], params["b_txt_fc"],
                params["w_fc_img"], params["w_fc_txt"], params["b_fc"])
    return pl.pallas_call(
        functools.partial(_fused_multimodal_kernel, gate_pad=gate_pad),
        out_shape=jax.ShapeDtypeStruct((B, ncp), jnp.float32),
        in_specs=[pl.BlockSpec(memory_space=pltpu.MemorySpace.VMEM)] * len(operands),
        out_specs=pl.BlockSpec(memory_space=pltpu.MemorySpace.VMEM),
    )(*operands)


# ----------------------------------------------------------------------------
# Plain-JAX glue (layout only)
# ----------------------------------------------------------------------------
def im2col_3x3(x_nhwc, k_pad):
    """3x3 'same' im2col: (B,H,W,C) -> (B, H*W, k_pad) bf16, patch order (kh,kw,c)."""
    B, H, W, C = x_nhwc.shape
    xp = jnp.pad(x_nhwc, ((0, 0), (1, 1), (1, 1), (0, 0)))
    patches = [xp[:, dh:dh + H, dw:dw + W, :] for dh in range(3) for dw in range(3)]
    p = jnp.concatenate(patches, axis=-1).reshape(B, H * W, 9 * C)
    p = jnp.pad(p, ((0, 0), (0, 0), (0, k_pad - 9 * C)))         # align contraction dim
    return p.astype(jnp.bfloat16)


def multimodal_forward(params, image_nchw, text_ids, *, num_classes):
    x = jnp.transpose(image_nchw, (0, 2, 3, 1))                  # NCHW -> NHWC
    patches = im2col_3x3(x, KPAD)                                # (B, HW, KPAD) bf16
    B, HW, KP = patches.shape
    patches = patches.reshape(B * HW, KP)                        # one fat M = B*HW matmul
    ids = text_ids.reshape(-1, 1).astype(jnp.int32)              # (B*L, 1) for in-kernel gather
    out_pad = fused_multimodal_pallas(ids, patches, params)      # (B, LANE) f32
    return out_pad[:, :num_classes]                              # drop lane padding


# ----------------------------------------------------------------------------
# Parameter init (logical shapes, then zero-padded / restacked / bf16-cast)
# ----------------------------------------------------------------------------
def init_params(key, *, batch, c_in, height, width, c_conv, image_output_features,
                vocab, embedding_dim, seq_len, lstm_hidden,
                text_output_features, num_classes):
    keys = jax.random.split(key, 12)

    def u(k, shape, scale=0.1):
        return jax.random.uniform(k, shape, jnp.float32, -1.0, 1.0) * scale

    def pad2(a, rows, cols):
        return jnp.pad(a, ((0, rows - a.shape[0]), (0, cols - a.shape[1])))

    def pad_gates(a, hidden, gate_pad):
        # (r, 4*hidden) -> (r, 4*gate_pad): each gate in its own 128-lane block.
        parts = [jnp.pad(a[:, g * hidden:(g + 1) * hidden],
                         ((0, 0), (0, gate_pad - hidden))) for g in range(4)]
        return jnp.concatenate(parts, axis=1)

    hw = height * width

    # logical-size parameters
    w_conv = u(keys[0], (9 * c_in, c_conv))            # conv in im2col layout
    b_conv = u(keys[1], (1, c_conv))
    w_img_fc = u(keys[2], (c_conv, image_output_features))
    b_img_fc = u(keys[3], (1, image_output_features))
    embedding = u(keys[4], (vocab, embedding_dim), 1.0)
    # LSTM gate weights restacked (i, f, g, o) along the output dim: (E, 4H).
    # TODO(synk): PyTorch has b_ih + b_hh per gate; sum them into b_lstm when
    # importing pretrained weights.  W_hh is omitted: with the zero initial
    # hidden state of this single-step LSTM it contributes exactly zero.
    w_ih = u(keys[5], (embedding_dim, 4 * lstm_hidden))
    b_lstm = u(keys[7], (1, 4 * lstm_hidden))
    w_txt_fc = u(keys[8], (lstm_hidden, text_output_features))
    b_txt_fc = u(keys[9], (1, text_output_features))
    w_fc = u(keys[10], (image_output_features + text_output_features, num_classes))
    b_fc = u(keys[11], (1, num_classes))

    # Block-pool constants, hoisted to init time (1/HW and 1/L folded in, both
    # exactly representable in bf16 for HW=256 / L=8).
    row = jnp.arange(batch, dtype=jnp.int32)[:, None]
    img_col = jnp.arange(batch * hw, dtype=jnp.int32)[None, :]
    img_pool = jnp.where(img_col // hw == row, 1.0 / hw, 0.0).astype(jnp.bfloat16)
    txt_col = jnp.arange(batch * seq_len, dtype=jnp.int32)[None, :]
    txt_pool = jnp.where(txt_col // seq_len == row, 1.0 / seq_len, 0.0).astype(jnp.bfloat16)

    return dict(
        img_pool=img_pool,                               # (B, B*HW) bf16
        txt_pool=txt_pool,                               # (B, B*L)  bf16
        # padded / bf16 matmul weights; f32 biases pre-shaped to (1, N)
        w_conv=pad2(w_conv, KPAD, LANE).astype(jnp.bfloat16),
        b_conv=pad2(b_conv, 1, LANE),
        w_img_fc=pad2(w_img_fc, LANE, LANE).astype(jnp.bfloat16),
        b_img_fc=pad2(b_img_fc, 1, LANE),
        embedding=pad2(embedding, VPAD, embedding_dim).astype(jnp.bfloat16),
        w_ih=pad_gates(w_ih, lstm_hidden, GATE_PAD).astype(jnp.bfloat16),
        b_lstm=pad_gates(b_lstm, lstm_hidden, GATE_PAD),
        w_txt_fc=pad2(w_txt_fc, LANE, LANE).astype(jnp.bfloat16),
        b_txt_fc=pad2(b_txt_fc, 1, LANE),
        # final fc pre-split for the concat fusion, rows/cols lane-padded
        w_fc_img=pad2(w_fc[:image_output_features], LANE, LANE).astype(jnp.bfloat16),
        w_fc_txt=pad2(w_fc[image_output_features:], LANE, LANE).astype(jnp.bfloat16),
        b_fc=pad2(b_fc, 1, LANE),
    )


if __name__ == "__main__":
    key = jax.random.PRNGKey(0)
    k_param, k_img, k_txt = jax.random.split(key, 3)

    # small shapes consistent with the module's forward
    B = 2
    C_in, Himg, Wimg = 3, 16, 16
    C_conv = 8
    image_output_features = 16
    vocab, seq_len = 50, 8
    embedding_dim = 32
    lstm_hidden = 32
    text_output_features = 16
    num_classes = 8

    params = init_params(
        k_param, batch=B, c_in=C_in, height=Himg, width=Wimg, c_conv=C_conv,
        image_output_features=image_output_features, vocab=vocab,
        embedding_dim=embedding_dim, seq_len=seq_len, lstm_hidden=lstm_hidden,
        text_output_features=text_output_features, num_classes=num_classes)

    image = jax.random.normal(k_img, (B, C_in, Himg, Wimg), dtype=jnp.float32)
    text = jax.random.randint(k_txt, (B, seq_len), 0, vocab, dtype=jnp.int32)

    fwd = jax.jit(functools.partial(multimodal_forward, num_classes=num_classes))
    out = fwd(params, image, text)
    out = jax.block_until_ready(out)
    assert out.shape == (B, num_classes), out.shape
    print("KERNEL_OK")
</pallas_src>

<mosaic_0001>
module attributes {stable_mosaic.version = 11 : i64} {
  func.func @_fused_multimodal_kernel(%arg0: memref<16x1xi32, #tpu.memory_space<vmem>>, %arg1: memref<512x32xbf16, #tpu.memory_space<vmem>>, %arg2: memref<2x512xbf16, #tpu.memory_space<vmem>>, %arg3: memref<2x16xbf16, #tpu.memory_space<vmem>>, %arg4: memref<32x128xbf16, #tpu.memory_space<vmem>>, %arg5: memref<1x128xf32, #tpu.memory_space<vmem>>, %arg6: memref<128x128xbf16, #tpu.memory_space<vmem>>, %arg7: memref<1x128xf32, #tpu.memory_space<vmem>>, %arg8: memref<128x32xbf16, #tpu.memory_space<vmem>>, %arg9: memref<32x512xbf16, #tpu.memory_space<vmem>>, %arg10: memref<1x512xf32, #tpu.memory_space<vmem>>, %arg11: memref<128x128xbf16, #tpu.memory_space<vmem>>, %arg12: memref<1x128xf32, #tpu.memory_space<vmem>>, %arg13: memref<128x128xbf16, #tpu.memory_space<vmem>>, %arg14: memref<128x128xbf16, #tpu.memory_space<vmem>>, %arg15: memref<1x128xf32, #tpu.memory_space<vmem>>, %arg16: memref<2x128xf32, #tpu.memory_space<vmem>>) attributes {dimension_semantics = [], scalar_prefetch = 0 : i64, scratch_operands = 0 : i64, tpu.core_type = #tpu.core_type<tc>} {
    %c0 = arith.constant 0 : index
    %c0_0 = arith.constant 0 : index
    %0 = vector.load %arg1[%c0, %c0_0] : memref<512x32xbf16, #tpu.memory_space<vmem>>, vector<512x32xbf16>
    %c0_1 = arith.constant 0 : index
    %c0_2 = arith.constant 0 : index
    %1 = vector.load %arg4[%c0_1, %c0_2] : memref<32x128xbf16, #tpu.memory_space<vmem>>, vector<32x128xbf16>
    %cst = arith.constant dense<0.000000e+00> : vector<512x128xf32>
    %2 = tpu.matmul %0, %1, %cst {dimension_numbers = #tpu.dot_dimension_numbers<[1], [0], [0], [1], [0, 0, 1, 1], [], []>} : vector<512x32xbf16>, vector<32x128xbf16>, vector<512x128xf32> -> vector<512x128xf32>
    %c0_3 = arith.constant 0 : index
    %c0_4 = arith.constant 0 : index
    %3 = vector.load %arg5[%c0_3, %c0_4] : memref<1x128xf32, #tpu.memory_space<vmem>>, vector<1x128xf32>
    %4 = vector.broadcast %3 : vector<1x128xf32> to vector<512x128xf32>
    %5 = arith.addf %2, %4 : vector<512x128xf32>
    %cst_5 = arith.constant 0.000000e+00 : f32
    %6 = vector.broadcast %cst_5 : f32 to vector<512x128xf32>
    %7 = arith.maximumf %5, %6 : vector<512x128xf32>
    %c0_6 = arith.constant 0 : index
    %c0_7 = arith.constant 0 : index
    %8 = vector.load %arg2[%c0_6, %c0_7] : memref<2x512xbf16, #tpu.memory_space<vmem>>, vector<2x512xbf16>
    %9 = arith.truncf %7 : vector<512x128xf32> to vector<512x128xbf16>
    %cst_8 = arith.constant dense<0.000000e+00> : vector<2x128xf32>
    %10 = tpu.matmul %8, %9, %cst_8 {dimension_numbers = #tpu.dot_dimension_numbers<[1], [0], [0], [1], [0, 0, 1, 1], [], []>} : vector<2x512xbf16>, vector<512x128xbf16>, vector<2x128xf32> -> vector<2x128xf32>
    %11 = arith.truncf %10 : vector<2x128xf32> to vector<2x128xbf16>
    %c0_9 = arith.constant 0 : index
    %c0_10 = arith.constant 0 : index
    %12 = vector.load %arg6[%c0_9, %c0_10] : memref<128x128xbf16, #tpu.memory_space<vmem>>, vector<128x128xbf16>
    %cst_11 = arith.constant dense<0.000000e+00> : vector<2x128xf32>
    %13 = tpu.matmul %11, %12, %cst_11 {dimension_numbers = #tpu.dot_dimension_numbers<[1], [0], [0], [1], [0, 0, 1, 1], [], []>} : vector<2x128xbf16>, vector<128x128xbf16>, vector<2x128xf32> -> vector<2x128xf32>
    %c0_12 = arith.constant 0 : index
    %c0_13 = arith.constant 0 : index
    %14 = vector.load %arg7[%c0_12, %c0_13] : memref<1x128xf32, #tpu.memory_space<vmem>>, vector<1x128xf32>
    %15 = vector.broadcast %14 : vector<1x128xf32> to vector<2x128xf32>
    %16 = arith.addf %13, %15 : vector<2x128xf32>
    %c0_14 = arith.constant 0 : index
    %c0_15 = arith.constant 0 : index
    %17 = vector.load %arg0[%c0_14, %c0_15] : memref<16x1xi32, #tpu.memory_space<vmem>>, vector<16x1xi32>
    %18 = tpu.iota {dimensions = array<i32: 1>} : vector<16x128xi32>
    %19 = vector.broadcast %17 : vector<16x1xi32> to vector<16x128xi32>
    %20 = arith.cmpi eq, %18, %19 : vector<16x128xi32>
    %cst_16 = arith.constant 1.000000e+00 : f32
    %cst_17 = arith.constant 0.000000e+00 : f32
    %21 = vector.broadcast %cst_16 : f32 to vector<16x128xf32>
    %22 = vector.broadcast %cst_17 : f32 to vector<16x128xf32>
    %23 = arith.select %20, %21, %22 : vector<16x128xi1>, vector<16x128xf32>
    %24 = arith.truncf %23 : vector<16x128xf32> to vector<16x128xbf16>
    %c0_18 = arith.constant 0 : index
    %c0_19 = arith.constant 0 : index
    %25 = vector.load %arg8[%c0_18, %c0_19] : memref<128x32xbf16, #tpu.memory_space<vmem>>, vector<128x32xbf16>
    %cst_20 = arith.constant dense<0.000000e+00> : vector<16x32xf32>
    %26 = tpu.matmul %24, %25, %cst_20 {dimension_numbers = #tpu.dot_dimension_numbers<[1], [0], [0], [1], [0, 0, 1, 1], [], []>} : vector<16x128xbf16>, vector<128x32xbf16>, vector<16x32xf32> -> vector<16x32xf32>
    %c0_21 = arith.constant 0 : index
    %c0_22 = arith.constant 0 : index
    %27 = vector.load %arg3[%c0_21, %c0_22] : memref<2x16xbf16, #tpu.memory_space<vmem>>, vector<2x16xbf16>
    %28 = arith.truncf %26 : vector<16x32xf32> to vector<16x32xbf16>
    %cst_23 = arith.constant dense<0.000000e+00> : vector<2x32xf32>
    %29 = tpu.matmul %27, %28, %cst_23 {dimension_numbers = #tpu.dot_dimension_numbers<[1], [0], [0], [1], [0, 0, 1, 1], [], []>} : vector<2x16xbf16>, vector<16x32xbf16>, vector<2x32xf32> -> vector<2x32xf32>
    %30 = arith.truncf %29 : vector<2x32xf32> to vector<2x32xbf16>
    %c0_24 = arith.constant 0 : index
    %c0_25 = arith.constant 0 : index
    %31 = vector.load %arg9[%c0_24, %c0_25] : memref<32x512xbf16, #tpu.memory_space<vmem>>, vector<32x512xbf16>
    %cst_26 = arith.constant dense<0.000000e+00> : vector<2x512xf32>
    %32 = tpu.matmul %30, %31, %cst_26 {dimension_numbers = #tpu.dot_dimension_numbers<[1], [0], [0], [1], [0, 0, 1, 1], [], []>} : vector<2x32xbf16>, vector<32x512xbf16>, vector<2x512xf32> -> vector<2x512xf32>
    %c0_27 = arith.constant 0 : index
    %c0_28 = arith.constant 0 : index
    %33 = vector.load %arg10[%c0_27, %c0_28] : memref<1x512xf32, #tpu.memory_space<vmem>>, vector<1x512xf32>
    %34 = vector.broadcast %33 : vector<1x512xf32> to vector<2x512xf32>
    %35 = arith.addf %32, %34 : vector<2x512xf32>
    %36 = vector.extract_strided_slice %35 {offsets = [0, 0], sizes = [2, 128], strides = [1, 1]} : vector<2x512xf32> to vector<2x128xf32>
    %37 = arith.negf %36 : vector<2x128xf32>
    %38 = math.exp %37 : vector<2x128xf32>
    %cst_29 = arith.constant 1.000000e+00 : f32
    %39 = vector.broadcast %cst_29 : f32 to vector<2x128xf32>
    %40 = arith.addf %39, %38 : vector<2x128xf32>
    %41 = arith.divf %39, %40 : vector<2x128xf32>
    %42 = vector.extract_strided_slice %35 {offsets = [0, 256], sizes = [2, 128], strides = [1, 1]} : vector<2x512xf32> to vector<2x128xf32>
    %43 = math.tanh %42 : vector<2x128xf32>
    %44 = vector.extract_strided_slice %35 {offsets = [0, 384], sizes = [2, 128], strides = [1, 1]} : vector<2x512xf32> to vector<2x128xf32>
    %45 = arith.negf %44 : vector<2x128xf32>
    %46 = math.exp %45 : vector<2x128xf32>
    %cst_30 = arith.constant 1.000000e+00 : f32
    %47 = vector.broadcast %cst_30 : f32 to vector<2x128xf32>
    %48 = arith.addf %47, %46 : vector<2x128xf32>
    %49 = arith.divf %47, %48 : vector<2x128xf32>
    %50 = arith.mulf %41, %43 : vector<2x128xf32>
    %51 = math.tanh %50 : vector<2x128xf32>
    %52 = arith.mulf %49, %51 : vector<2x128xf32>
    %53 = arith.truncf %52 : vector<2x128xf32> to vector<2x128xbf16>
    %c0_31 = arith.constant 0 : index
    %c0_32 = arith.constant 0 : index
    %54 = vector.load %arg11[%c0_31, %c0_32] : memref<128x128xbf16, #tpu.memory_space<vmem>>, vector<128x128xbf16>
    %cst_33 = arith.constant dense<0.000000e+00> : vector<2x128xf32>
    %55 = tpu.matmul %53, %54, %cst_33 {dimension_numbers = #tpu.dot_dimension_numbers<[1], [0], [0], [1], [0, 0, 1, 1], [], []>} : vector<2x128xbf16>, vector<128x128xbf16>, vector<2x128xf32> -> vector<2x128xf32>
    %c0_34 = arith.constant 0 : index
    %c0_35 = arith.constant 0 : index
    %56 = vector.load %arg12[%c0_34, %c0_35] : memref<1x128xf32, #tpu.memory_space<vmem>>, vector<1x128xf32>
    %57 = vector.broadcast %56 : vector<1x128xf32> to vector<2x128xf32>
    %58 = arith.addf %55, %57 : vector<2x128xf32>
    %59 = arith.truncf %16 : vector<2x128xf32> to vector<2x128xbf16>
    %c0_36 = arith.constant 0 : index
    %c0_37 = arith.constant 0 : index
    %60 = vector.load %arg13[%c0_36, %c0_37] : memref<128x128xbf16, #tpu.memory_space<vmem>>, vector<128x128xbf16>
    %cst_38 = arith.constant dense<0.000000e+00> : vector<2x128xf32>
    %61 = tpu.matmul %59, %60, %cst_38 {dimension_numbers = #tpu.dot_dimension_numbers<[1], [0], [0], [1], [0, 0, 1, 1], [], []>} : vector<2x128xbf16>, vector<128x128xbf16>, vector<2x128xf32> -> vector<2x128xf32>
    %62 = arith.truncf %58 : vector<2x128xf32> to vector<2x128xbf16>
    %c0_39 = arith.constant 0 : index
    %c0_40 = arith.constant 0 : index
    %63 = vector.load %arg14[%c0_39, %c0_40] : memref<128x128xbf16, #tpu.memory_space<vmem>>, vector<128x128xbf16>
    %cst_41 = arith.constant dense<0.000000e+00> : vector<2x128xf32>
    %64 = tpu.matmul %62, %63, %cst_41 {dimension_numbers = #tpu.dot_dimension_numbers<[1], [0], [0], [1], [0, 0, 1, 1], [], []>} : vector<2x128xbf16>, vector<128x128xbf16>, vector<2x128xf32> -> vector<2x128xf32>
    %65 = arith.addf %61, %64 : vector<2x128xf32>
    %c0_42 = arith.constant 0 : index
    %c0_43 = arith.constant 0 : index
    %66 = vector.load %arg15[%c0_42, %c0_43] : memref<1x128xf32, #tpu.memory_space<vmem>>, vector<1x128xf32>
    %67 = vector.broadcast %66 : vector<1x128xf32> to vector<2x128xf32>
    %68 = arith.addf %65, %67 : vector<2x128xf32>
    %c0_44 = arith.constant 0 : index
    %c0_45 = arith.constant 0 : index
    %69 = vector.load %arg16[%c0_44, %c0_45] : memref<2x128xf32, #tpu.memory_space<vmem>>, vector<2x128xf32>
    tpu.vector_store %arg16[%c0_44, %c0_45], %68 {strides = array<i32>} : memref<2x128xf32, #tpu.memory_space<vmem>>, vector<2x128xf32>,
    return
  }
}

</mosaic_0001>

<bundles_post_ra>
// kernel: multimodal_forward.1
= control target key start
LH: loop header
LB: loop body
LE: loop exit
PB: predicated region body
PF: predicated region fallthrough
CT: control target
= control target key end

     0   :  { %s2833_s0 = inlined_call_operand.vmem [shape: s32[16,1], index: 0, kind: input, shape index: {}]   ;;  %s2834_s1 = inlined_call_operand.vmem [shape: bf16[512,32], index: 1, kind: input, shape index: {}]   ;;  %s2835_s2 = inlined_call_operand.vmem [shape: bf16[2,512], index: 2, kind: input, shape index: {}]   ;;  %s2836_s3 = inlined_call_operand.vmem [shape: bf16[2,16], index: 3, kind: input, shape index: {}]   ;;  %s2837_s4 = inlined_call_operand.vmem [shape: bf16[32,128], index: 4, kind: input, shape index: {}]   ;;  %s2838_s5 = inlined_call_operand.vmem [shape: f32[1,128], index: 5, kind: input, shape index: {}]   ;;  %s2839_s6 = inlined_call_operand.vmem [shape: bf16[128,128], index: 6, kind: input, shape index: {}]   ;;  %s2840_s7 = inlined_call_operand.vmem [shape: f32[1,128], index: 7, kind: input, shape index: {}]   ;;  %s2841_s8 = inlined_call_operand.vmem [shape: bf16[128,32], index: 8, kind: input, shape index: {}]   ;;  %s2842_s9 = inlined_call_operand.vmem [shape: bf16[32,512], index: 9, kind: input, shape index: {}]   ;;  %s2843_s10 = inlined_call_operand.vmem [shape: f32[1,512], index: 10, kind: input, shape index: {}]   ;;  %s2844_s11 = inlined_call_operand.vmem [shape: bf16[128,128], index: 11, kind: input, shape index: {}]   ;;  %s2845_s12 = inlined_call_operand.vmem [shape: f32[1,128], index: 12, kind: input, shape index: {}]   ;;  %s2846_s13 = inlined_call_operand.vmem [shape: bf16[128,128], index: 13, kind: input, shape index: {}]   ;;  %s2847_s14 = inlined_call_operand.vmem [shape: bf16[128,128], index: 14, kind: input, shape index: {}]   ;;  %s2848_s15 = inlined_call_operand.vmem [shape: f32[1,128], index: 15, kind: input, shape index: {}]   ;;  %s2849_s16 = inlined_call_operand.hbm [shape: f32[2,128], index: 16, kind: output, shape index: {}]  }
   0x1   :  { %2851 = sst [smem:[#allocation5_spill]] %s2833_s0 }
   0x2   :  { %v2115_v0 = vld [vmem:[%s2837_s4] sm:$0xff]   ;;  %v2116_v1 = vld [vmem:[%s2837_s4 + $0x8] sm:$0xff]   ;;  %vm302_vm0 = vcmask 261120   ;;  %v2119_v4 = vld [vmem:[%s2834_s1 + $0x10] sm:$0xff]  }
   0x3   :  { %1934 = vmatprep.subr.bf16.mxu0 %v2115_v0  ;;  %v2117_v2 = vld [vmem:[%s2834_s1] sm:$0xff]   ;;  %v2118_v3 = vld [vmem:[%s2834_s1 + $0x8] sm:$0xff]   ;;  %v2120_v5 = vld [vmem:[%s2834_s1 + $0x18] sm:$0xff]  }
   0x4   :  { %1935 = vmatpush3.bf16.msra.mxu0 %v2115_v0  ;;  %1938 = vmatprep.mubr.msk.bf16.mxu0 %vm302_vm0, %v2117_v2  ;;  %v2121_v6 = vld [vmem:[%s2834_s1 + $0x20] sm:$0xff]   ;;  %v2122_v7 = vld [vmem:[%s2834_s1 + $0x28] sm:$0xff]   ;;  %v2123_v8 = vld [vmem:[%s2834_s1 + $0x30] sm:$0xff]  }
   0x5   :  { %1936 = vmatprep.subr.bf16.mxu0 %v2116_v1  ;;  %v2124_v9 = vld [vmem:[%s2834_s1 + $0x38] sm:$0xff]   ;;  %v2125_v10 = vld [vmem:[%s2834_s1 + $0x40] sm:$0xff]   ;;  %v2126_v11 = vld [vmem:[%s2834_s1 + $0x48] sm:$0xff]  }
   0x6   :  { %v2127_v12 = vld [vmem:[%s2834_s1 + $0x50] sm:$0xff]   ;;  %v2128_v13 = vld [vmem:[%s2834_s1 + $0x58] sm:$0xff]   ;;  %v2129_v14 = vld [vmem:[%s2834_s1 + $0x60] sm:$0xff]  }
   0x7   :  { %v2130_v15 = vld [vmem:[%s2834_s1 + $0x68] sm:$0xff]   ;;  %v2131_v16 = vld [vmem:[%s2834_s1 + $0x70] sm:$0xff]   ;;  %v2132_v17 = vld [vmem:[%s2834_s1 + $0x78] sm:$0xff]  }
   0x8   :  { %1937 = vmatpush3.bf16.msra.mxu0 %v2116_v1  ;;  %v2133_v18 = vld [vmem:[%s2834_s1 + $0x80] sm:$0xff]  }
   0xb   :  { %1939 = vmatmul.mubr.msk.bf16.vlgmr.msra.gmra.mrb[0].mxu0 %vm302_vm0, %v2118_v3 }
   0xc   :  { %1942 = vmatprep.mubr.msk.bf16.mxu0 %vm302_vm0, %v2119_v4 }
  0x13   :  { %1943 = vmatmul.mubr.msk.bf16.gmra.mrb[4].mxu0 %vm302_vm0, %v2120_v5 }
  0x14   :  { %1946 = vmatprep.mubr.msk.bf16.mxu0 %vm302_vm0, %v2121_v6 }
  0x1b   :  { %1947 = vmatmul.mubr.msk.bf16.gmra.mrb[8].mxu0 %vm302_vm0, %v2122_v7 }
  0x1c   :  { %1950 = vmatprep.mubr.msk.bf16.mxu0 %vm302_vm0, %v2123_v8 }
  0x23   :  { %1951 = vmatmul.mubr.msk.bf16.gmra.mrb[12].mxu0 %vm302_vm0, %v2124_v9 }
  0x24   :  { %1954 = vmatprep.mubr.msk.bf16.mxu0 %vm302_vm0, %v2125_v10 }
  0x2b   :  { %1955 = vmatmul.mubr.msk.bf16.gmra.mrb[16].mxu0 %vm302_vm0, %v2126_v11 }
  0x2c   :  { %1958 = vmatprep.mubr.msk.bf16.mxu0 %vm302_vm0, %v2127_v12 }
  0x33   :  { %1959 = vmatmul.mubr.msk.bf16.gmra.mrb[20].mxu0 %vm302_vm0, %v2128_v13 }
  0x34   :  { %1962 = vmatprep.mubr.msk.bf16.mxu0 %vm302_vm0, %v2129_v14 }
  0x3b   :  { %1963 = vmatmul.mubr.msk.bf16.gmra.mrb[24].mxu0 %vm302_vm0, %v2130_v15 }
  0x3c   :  { %1966 = vmatprep.mubr.msk.bf16.mxu0 %vm302_vm0, %v2131_v16 }
  0x3d   :  { %21 = vsyncpa [#allocation3], 0  ;;  %v2134_v19 = vld [vmem:[%s2834_s1 + $0x88] sm:$0xff]   ;;  %v2135_v20 = vld [vmem:[%s2834_s1 + $0x90] sm:$0xff]   ;;  %v2237_v35 = vmov 1966171168   ;;  %v797_v37 = vlaneseq }
  0x3e   :  { %v2136_v21 = vld [vmem:[%s2834_s1 + $0x98] sm:$0xff]   ;;  %v2137_v22 = vld [vmem:[%s2834_s1 + $0xa0] sm:$0xff]   ;;  %v2138_v23 = vld [vmem:[%s2834_s1 + $0xa8] sm:$0xff]   ;;  %v795_v36 = vunpack.c.l.s4 %v2237_v35  ;;  %s2852_s28 = sld [smem:[#allocation5_spill]]  ;;  %v2238_v4 = vmov 0   ;;  %vm2240_vm1 = vmmov 0  }
  0x3f   :  { %v2139_v24 = vld [vmem:[%s2834_s1 + $0xb0] sm:$0xff]   ;;  %v2140_v25 = vld [vmem:[%s2834_s1 + $0xb8] sm:$0xff]   ;;  %v2141_v26 = vld [vmem:[%s2834_s1 + $0xc0] sm:$0xff]   ;;  %v2468_v40 = vshrl.u32 %v797_v37, 7  ;;  %2114 = vset.pattern.permute.xlu0 %v2238_v4  ;;  %vm1128_vm5 = vcmask 130048  }
  0x40   :  { %v2142_v27 = vld [vmem:[%s2834_s1 + $0xc8] sm:$0xff]   ;;  %v2143_v28 = vld [vmem:[%s2834_s1 + $0xd0] sm:$0xff]   ;;  %v2144_v29 = vld [vmem:[%s2834_s1 + $0xd8] sm:$0xff]   ;;  %v796_v39 = vunpack.c.0.s8 %v795_v36 }
  0x41   :  { %v2145_v30 = vld [vmem:[%s2834_s1 + $0xe0] sm:$0xff]   ;;  %v2146_v31 = vld [vmem:[%s2834_s1 + $0xe8] sm:$0xff]   ;;  %v2147_v32 = vld [vmem:[%s2834_s1 + $0xf0] sm:$0xff]  }
  0x42   :  { %v2148_v33 = vld [vmem:[%s2834_s1 + $0xf8] sm:$0xff]   ;;  %v2465_v34 = vld [vmem:[%s2838_s5] ss:$0 sm:$0xff]  ;;  %v799_v47 = vsub.s32 %v796_v39, %v2468_v40 }
  0x43   :  { %1967 = vmatmul.mubr.msk.bf16.gmra.mrb[28].mxu0 %vm302_vm0, %v2132_v17  ;;  %v1750_v43 = vld.sshfl [vmem:[%s2835_s2] sm:$0x33 pattern:$0x75316420] }
  0x44   :  { %1970 = vmatprep.mubr.msk.bf16.mxu0 %vm302_vm0, %v2133_v18  ;;  %v793_v46 = vcombine.high %v1750_v43, %v1750_v43  ;;  %v2478_v54 = vrot.slane %v1750_v43, %v799_v47  ;;  %v1006_v1 = vld [vmem:[%s2852_s28] sm:$0xff]  ;;  %v1007_v8 = vld [vmem:[%s2852_s28 + $0x8] sm:$0xff] }
  0x45   :  { %1011 = vperm.xlu0 %2114, %v1006_v1  }
  0x46   :  { %v807_v51 = vrot.slane %v793_v46, %v799_v47 }
  0x48   :  { %v809_v58 = vcombine.high %v807_v51, %v807_v51 }
  0x49   :  { %1014 = vperm.xlu0 %2114, %v1007_v8  }
  0x4a   :  { %886 = vmatprep.mubr.bf16.mxu1 %v809_v58 }
  0x4b   :  { %1971 = vmatmul.mubr.msk.bf16.gmra.mrb[32].mxu0 %vm302_vm0, %v2134_v19 }
  0x4c   :  { %1974 = vmatprep.mubr.msk.bf16.mxu0 %vm302_vm0, %v2135_v20 }
  0x53   :  { %1975 = vmatmul.mubr.msk.bf16.gmra.mrb[36].mxu0 %vm302_vm0, %v2136_v21 }
  0x54   :  { %1978 = vmatprep.mubr.msk.bf16.mxu0 %vm302_vm0, %v2137_v22 }
  0x5b   :  { %1979 = vmatmul.mubr.msk.bf16.gmra.mrb[40].mxu0 %vm302_vm0, %v2138_v23 }
  0x5c   :  { %1982 = vmatprep.mubr.msk.bf16.mxu0 %vm302_vm0, %v2139_v24 }
  0x63   :  { %1983 = vmatmul.mubr.msk.bf16.gmra.mrb[44].mxu0 %vm302_vm0, %v2140_v25 }
  0x64   :  { %1986 = vmatprep.mubr.msk.bf16.mxu0 %vm302_vm0, %v2141_v26 }
  0x6b   :  { %1987 = vmatmul.mubr.msk.bf16.gmra.mrb[48].mxu0 %vm302_vm0, %v2142_v27 }
  0x6c   :  { %1990 = vmatprep.mubr.msk.bf16.mxu0 %vm302_vm0, %v2143_v28 }
  0x73   :  { %1991 = vmatmul.mubr.msk.bf16.gmra.mrb[52].mxu0 %vm302_vm0, %v2144_v29 }
  0x74   :  { %1994 = vmatprep.mubr.msk.bf16.mxu0 %vm302_vm0, %v2145_v30 }
  0x7b   :  { %1995 = vmatmul.mubr.msk.bf16.gmra.mrb[56].mxu0 %vm302_vm0, %v2146_v31 }
  0x7c   :  { %1998 = vmatprep.mubr.msk.bf16.mxu0 %vm302_vm0, %v2147_v32 }
  0x83   :  { %1999 = vmatmul.mubr.msk.bf16.gmra.mrb[60].mxu0 %vm302_vm0, %v2148_v33 }
  0x84   :  { %846 = vmatprep.mubr.bf16.mxu0 %v807_v51 }
  0xde   :  { %v1940_v38 = vpop.f32.mrb[0].mxu0 }
  0xdf   :  { %v442_v41 = vadd.f32 %v1940_v38, %v2465_v34  ;;  %v433_v42 = vpop.f32.mrb[1].mxu0 }
  0xe0   :  { %v434_v44 = vadd.f32 %v2465_v34, %v433_v42  ;;  %v1941_v45 = vpop.f32.mrb[2].mxu0 }
  0xe1   :  { %v445_v48 = vadd.f32 %v1941_v45, %v2465_v34  ;;  %v436_v49 = vpop.f32.mrb[3].mxu0  ;;  %v690_v52 = vmax.f32 %v442_v41, 0.0 }
  0xe2   :  { %v437_v50 = vadd.f32 %v2465_v34, %v436_v49  ;;  %v688_v55 = vmax.f32 %v434_v44, 0.0 }
  0xe3   :  { %v691_v53 = vmax.f32 %v445_v48, 0.0 }
  0xe4   :  { %v689_v56 = vmax.f32 %v437_v50, 0.0 }
  0xe5   :  { %v2480_v57 = vpack.c.bf16 %v691_v53, %v690_v52 }
  0xe6   :  { %v2482_v59 = vpack.c.bf16 %v689_v56, %v688_v55  ;;  %v1944_v60 = vpop.f32.mrb[4].mxu0 }
  0xe7   :  { %v458_v61 = vadd.f32 %v1944_v60, %v2465_v34  ;;  %v449_v62 = vpop.f32.mrb[5].mxu0 }
  0xe8   :  { %v450_v63 = vadd.f32 %v2465_v34, %v449_v62  ;;  %v1945_v0 = vpop.f32.mrb[6].mxu0 }
  0xe9   :  { %v461_v2 = vadd.f32 %v1945_v0, %v2465_v34  ;;  %v452_v3 = vpop.f32.mrb[7].mxu0  ;;  %v694_v6 = vmax.f32 %v458_v61, 0.0 }
  0xea   :  { %v453_v5 = vadd.f32 %v2465_v34, %v452_v3  ;;  %v692_v9 = vmax.f32 %v450_v63, 0.0 }
  0xeb   :  { %v695_v7 = vmax.f32 %v461_v2, 0.0 }
  0xec   :  { %v693_v10 = vmax.f32 %v453_v5, 0.0 }
  0xed   :  { %v2495_v11 = vpack.c.bf16 %v695_v7, %v694_v6 }
  0xee   :  { %v2497_v12 = vpack.c.bf16 %v693_v10, %v692_v9  ;;  %v1948_v13 = vpop.f32.mrb[8].mxu0 }
  0xef   :  { %v474_v14 = vadd.f32 %v1948_v13, %v2465_v34  ;;  %v465_v15 = vpop.f32.mrb[9].mxu0 }
  0xf0   :  { %v466_v16 = vadd.f32 %v2465_v34, %v465_v15  ;;  %v1949_v17 = vpop.f32.mrb[10].mxu0 }
  0xf1   :  { %v477_v18 = vadd.f32 %v1949_v17, %v2465_v34  ;;  %v468_v19 = vpop.f32.mrb[11].mxu0  ;;  %v698_v21 = vmax.f32 %v474_v14, 0.0 }
  0xf2   :  { %v469_v20 = vadd.f32 %v2465_v34, %v468_v19  ;;  %v696_v23 = vmax.f32 %v466_v16, 0.0 }
  0xf3   :  { %v699_v22 = vmax.f32 %v477_v18, 0.0 }
  0xf4   :  { %v697_v24 = vmax.f32 %v469_v20, 0.0 }
  0xf5   :  { %v2503_v25 = vpack.c.bf16 %v699_v22, %v698_v21 }
  0xf6   :  { %v2505_v26 = vpack.c.bf16 %v697_v24, %v696_v23  ;;  %v1952_v27 = vpop.f32.mrb[12].mxu0 }
  0xf7   :  { %v490_v28 = vadd.f32 %v1952_v27, %v2465_v34  ;;  %v481_v29 = vpop.f32.mrb[13].mxu0 }
  0xf8   :  { %v482_v30 = vadd.f32 %v2465_v34, %v481_v29  ;;  %v1953_v31 = vpop.f32.mrb[14].mxu0 }
  0xf9   :  { %v493_v32 = vadd.f32 %v1953_v31, %v2465_v34  ;;  %v484_v33 = vpop.f32.mrb[15].mxu0  ;;  %v702_v36 = vmax.f32 %v490_v28, 0.0 }
  0xfa   :  { %v485_v35 = vadd.f32 %v2465_v34, %v484_v33  ;;  %v700_v39 = vmax.f32 %v482_v30, 0.0 }
  0xfb   :  { %v703_v38 = vmax.f32 %v493_v32, 0.0 }
  0xfc   :  { %v701_v41 = vmax.f32 %v485_v35, 0.0 }
  0xfd   :  { %v2511_v42 = vpack.c.bf16 %v703_v38, %v702_v36 }
  0xfe   :  { %v2513_v43 = vpack.c.bf16 %v701_v41, %v700_v39  ;;  %v1956_v44 = vpop.f32.mrb[16].mxu0 }
  0xff   :  { %v506_v45 = vadd.f32 %v1956_v44, %v2465_v34  ;;  %v497_v46 = vpop.f32.mrb[17].mxu0 }
 0x100   :  { %v498_v47 = vadd.f32 %v2465_v34, %v497_v46  ;;  %v1957_v48 = vpop.f32.mrb[18].mxu0 }
 0x101   :  { %v509_v49 = vadd.f32 %v1957_v48, %v2465_v34  ;;  %v500_v50 = vpop.f32.mrb[19].mxu0  ;;  %v706_v52 = vmax.f32 %v506_v45, 0.0 }
 0x102   :  { %v501_v51 = vadd.f32 %v2465_v34, %v500_v50  ;;  %v704_v55 = vmax.f32 %v498_v47, 0.0 }
 0x103   :  { %v707_v53 = vmax.f32 %v509_v49, 0.0 }
 0x104   :  { %v705_v56 = vmax.f32 %v501_v51, 0.0 }
 0x105   :  { %v762_v58 = vpack.c.bf16 %v707_v53, %v706_v52 }
 0x106   :  { %v761_v60 = vpack.c.bf16 %v705_v56, %v704_v55  ;;  %v1960_v61 = vpop.f32.mrb[20].mxu0 }
 0x107   :  { %v522_v62 = vadd.f32 %v1960_v61, %v2465_v34  ;;  %v513_v63 = vpop.f32.mrb[21].mxu0 }
 0x108   :  { %v514_v0 = vadd.f32 %v2465_v34, %v513_v63  ;;  %v1961_v1 = vpop.f32.mrb[22].mxu0  ;;  %1843 = vmatprep.subr.bf16.mxu0 %v761_v60 }
 0x109   :  { %v525_v2 = vadd.f32 %v1961_v1, %v2465_v34  ;;  %v516_v3 = vpop.f32.mrb[23].mxu0  ;;  %1844 = vmatpush3.bf16.msra.mxu0 %v2482_v59  ;;  %v710_v6 = vmax.f32 %v522_v62, 0.0 }
 0x10a   :  { %v517_v5 = vadd.f32 %v2465_v34, %v516_v3  ;;  %1845 = vmatprep.subr.bf16.mxu0 %v762_v58  ;;  %v708_v8 = vmax.f32 %v514_v0, 0.0 }
 0x10b   :  { %v711_v7 = vmax.f32 %v525_v2, 0.0 }
 0x10c   :  { %v709_v9 = vmax.f32 %v517_v5, 0.0 }
 0x10d   :  { %v764_v10 = vpack.c.bf16 %v711_v7, %v710_v6  ;;  %1846 = vmatpush3.bf16.msra.mxu0 %v2480_v57 }
 0x10e   :  { %v763_v13 = vpack.c.bf16 %v709_v9, %v708_v8  ;;  %v1964_v14 = vpop.f32.mrb[24].mxu0 }
 0x10f   :  { %v538_v15 = vadd.f32 %v1964_v14, %v2465_v34  ;;  %v529_v16 = vpop.f32.mrb[25].mxu0 }
 0x110   :  { %v530_v17 = vadd.f32 %v2465_v34, %v529_v16  ;;  %v1965_v18 = vpop.f32.mrb[26].mxu0  ;;  %1847 = vmatprep.subr.bf16.mxu0 %v763_v13 }
 0x111   :  { %v541_v59 = vadd.f32 %v1965_v18, %v2465_v34  ;;  %v532_v19 = vpop.f32.mrb[27].mxu0  ;;  %1848 = vmatpush3.bf16.msra.mxu0 %v2497_v12  ;;  %v714_v21 = vmax.f32 %v538_v15, 0.0 }
 0x112   :  { %v533_v20 = vadd.f32 %v2465_v34, %v532_v19  ;;  %1849 = vmatprep.subr.bf16.mxu0 %v764_v10  ;;  %v712_v57 = vmax.f32 %v530_v17, 0.0 }
 0x113   :  { %v715_v22 = vmax.f32 %v541_v59, 0.0 }
 0x114   :  { %v713_v23 = vmax.f32 %v533_v20, 0.0 }
 0x115   :  { %v766_v24 = vpack.c.bf16 %v715_v22, %v714_v21  ;;  %1850 = vmatpush3.bf16.msra.mxu0 %v2495_v11 }
 0x116   :  { %v765_v27 = vpack.c.bf16 %v713_v23, %v712_v57  ;;  %v1968_v28 = vpop.f32.mrb[28].mxu0 }
 0x117   :  { %v554_v29 = vadd.f32 %v1968_v28, %v2465_v34  ;;  %v545_v30 = vpop.f32.mrb[29].mxu0 }
 0x118   :  { %v546_v31 = vadd.f32 %v2465_v34, %v545_v30  ;;  %v1969_v32 = vpop.f32.mrb[30].mxu0  ;;  %1851 = vmatprep.subr.bf16.mxu0 %v765_v27 }
 0x119   :  { %v557_v12 = vadd.f32 %v1969_v32, %v2465_v34  ;;  %v548_v33 = vpop.f32.mrb[31].mxu0  ;;  %1852 = vmatpush3.bf16.msra.mxu0 %v2505_v26  ;;  %v718_v36 = vmax.f32 %v554_v29, 0.0 }
 0x11a   :  { %v549_v35 = vadd.f32 %v2465_v34, %v548_v33  ;;  %1853 = vmatprep.subr.bf16.mxu0 %v766_v24  ;;  %v716_v11 = vmax.f32 %v546_v31, 0.0 }
 0x11b   :  { %v719_v38 = vmax.f32 %v557_v12, 0.0 }
 0x11c   :  { %v717_v39 = vmax.f32 %v549_v35, 0.0 }
 0x11d   :  { %v768_v41 = vpack.c.bf16 %v719_v38, %v718_v36  ;;  %1854 = vmatpush3.bf16.msra.mxu0 %v2503_v25 }
 0x11e   :  { %v767_v44 = vpack.c.bf16 %v717_v39, %v716_v11  ;;  %v1972_v45 = vpop.f32.mrb[32].mxu0 }
 0x11f   :  { %v570_v46 = vadd.f32 %v1972_v45, %v2465_v34  ;;  %v561_v47 = vpop.f32.mrb[33].mxu0 }
 0x120   :  { %1855 = vmatprep.subr.bf16.mxu0 %v767_v44  ;;  %v562_v48 = vadd.f32 %v2465_v34, %v561_v47  ;;  %v1973_v49 = vpop.f32.mrb[34].mxu0 }
 0x121   :  { %1856 = vmatpush3.bf16.msra.mxu0 %v2513_v43  ;;  %v573_v26 = vadd.f32 %v1973_v49, %v2465_v34  ;;  %v564_v50 = vpop.f32.mrb[35].mxu0  ;;  %v722_v52 = vmax.f32 %v570_v46, 0.0 }
 0x122   :  { %1857 = vmatprep.subr.bf16.mxu0 %v768_v41  ;;  %v565_v51 = vadd.f32 %v2465_v34, %v564_v50  ;;  %v720_v25 = vmax.f32 %v562_v48, 0.0 }
 0x123   :  { %v723_v53 = vmax.f32 %v573_v26, 0.0 }
 0x124   :  { %v721_v55 = vmax.f32 %v565_v51, 0.0 }
 0x125   :  { %1858 = vmatpush3.bf16.msra.mxu0 %v2511_v42  ;;  %v2543_v56 = vpack.c.bf16 %v723_v53, %v722_v52 }
 0x126   :  { %v1976_v58 = vpop.f32.mrb[36].mxu0  ;;  %v2545_v60 = vpack.c.bf16 %v721_v55, %v720_v25 }
 0x127   :  { %v586_v61 = vadd.f32 %v1976_v58, %v2465_v34  ;;  %v577_v43 = vpop.f32.mrb[37].mxu0 }
 0x128   :  { %v578_v62 = vadd.f32 %v2465_v34, %v577_v43  ;;  %v1977_v63 = vpop.f32.mrb[38].mxu0  ;;  %847 = vmatmul.mubr.bf16.vlgmr.msra.gmra.mrb[64].mxu0 %v2478_v54 }
 0x129   :  { %v589_v0 = vadd.f32 %v1977_v63, %v2465_v34  ;;  %v580_v1 = vpop.f32.mrb[39].mxu0  ;;  %1313 = vmatprep.mubr.bf16.mxu0 %v2238_v4  ;;  %v726_v2 = vmax.f32 %v586_v61, 0.0 }
 0x12a   :  { %v581_v42 = vadd.f32 %v2465_v34, %v580_v1  ;;  %v724_v5 = vmax.f32 %v578_v62, 0.0 }
 0x12b   :  { %v727_v3 = vmax.f32 %v589_v0, 0.0 }
 0x12c   :  { %v725_v6 = vmax.f32 %v581_v42, 0.0 }
 0x12d   :  { %v2553_v7 = vpack.c.bf16 %v727_v3, %v726_v2 }
 0x12e   :  { %v2555_v8 = vpack.c.bf16 %v725_v6, %v724_v5  ;;  %v1980_v9 = vpop.f32.mrb[40].mxu0 }
 0x12f   :  { %v602_v10 = vadd.f32 %v1980_v9, %v2465_v34  ;;  %v593_v13 = vpop.f32.mrb[41].mxu0 }
 0x130   :  { %v594_v14 = vadd.f32 %v2465_v34, %v593_v13  ;;  %v1981_v15 = vpop.f32.mrb[42].mxu0 }
 0x131   :  { %v605_v16 = vadd.f32 %v1981_v15, %v2465_v34  ;;  %v596_v17 = vpop.f32.mrb[43].mxu0  ;;  %v730_v59 = vmax.f32 %v602_v10, 0.0 }
 0x132   :  { %v597_v18 = vadd.f32 %v2465_v34, %v596_v17  ;;  %v728_v20 = vmax.f32 %v594_v14, 0.0 }
 0x133   :  { %v731_v19 = vmax.f32 %v605_v16, 0.0 }
 0x134   :  { %v729_v21 = vmax.f32 %v597_v18, 0.0 }
 0x135   :  { %v2561_v22 = vpack.c.bf16 %v731_v19, %v730_v59 }
 0x136   :  { %v2563_v57 = vpack.c.bf16 %v729_v21, %v728_v20  ;;  %v1984_v23 = vpop.f32.mrb[44].mxu0 }
 0x137   :  { %v618_v24 = vadd.f32 %v1984_v23, %v2465_v34  ;;  %v609_v27 = vpop.f32.mrb[45].mxu0 }
 0x138   :  { %v610_v28 = vadd.f32 %v2465_v34, %v609_v27  ;;  %v1985_v29 = vpop.f32.mrb[46].mxu0 }
 0x139   :  { %v621_v30 = vadd.f32 %v1985_v29, %v2465_v34  ;;  %v612_v31 = vpop.f32.mrb[47].mxu0  ;;  %v734_v12 = vmax.f32 %v618_v24, 0.0 }
 0x13a   :  { %v613_v32 = vadd.f32 %v2465_v34, %v612_v31  ;;  %v732_v35 = vmax.f32 %v610_v28, 0.0 }
 0x13b   :  { %v735_v33 = vmax.f32 %v621_v30, 0.0 }
 0x13c   :  { %v733_v36 = vmax.f32 %v613_v32, 0.0 }
 0x13d   :  { %v2569_v38 = vpack.c.bf16 %v735_v33, %v734_v12 }
 0x13e   :  { %v2571_v11 = vpack.c.bf16 %v733_v36, %v732_v35  ;;  %v1988_v39 = vpop.f32.mrb[48].mxu0 }
 0x13f   :  { %v634_v41 = vadd.f32 %v1988_v39, %v2465_v34  ;;  %v625_v44 = vpop.f32.mrb[49].mxu0 }
 0x140   :  { %v626_v45 = vadd.f32 %v2465_v34, %v625_v44  ;;  %v1989_v46 = vpop.f32.mrb[50].mxu0  ;;  %v2154_v44 = vld [vmem:[%s2839_s6 + $0x28] sm:$0xff]  }
 0x141   :  { %v637_v47 = vadd.f32 %v1989_v46, %v2465_v34  ;;  %v628_v48 = vpop.f32.mrb[51].mxu0  ;;  %v738_v26 = vmax.f32 %v634_v41, 0.0  ;;  %v808_v41 = vcombine.high %v2478_v54, %v2478_v54  ;;  %v2151_v54 = vld [vmem:[%s2839_s6 + $0x10] sm:$0xff]   ;;  %v2156_v46 = vld [vmem:[%s2839_s6 + $0x38] sm:$0xff]  }
 0x142   :  { %v629_v49 = vadd.f32 %v2465_v34, %v628_v48  ;;  %v736_v51 = vmax.f32 %v626_v45, 0.0  ;;  %v2155_v45 = vld [vmem:[%s2839_s6 + $0x30] sm:$0xff]  }
 0x143   :  { %v739_v50 = vmax.f32 %v637_v47, 0.0 }
 0x144   :  { %v737_v52 = vmax.f32 %v629_v49, 0.0 }
 0x145   :  { %v778_v53 = vpack.c.bf16 %v739_v50, %v738_v26 }
 0x146   :  { %v1992_v25 = vpop.f32.mrb[52].mxu0  ;;  %v777_v55 = vpack.c.bf16 %v737_v52, %v736_v51 }
 0x147   :  { %v650_v58 = vadd.f32 %v1992_v25, %v2465_v34  ;;  %v641_v61 = vpop.f32.mrb[53].mxu0 }
 0x148   :  { %v642_v43 = vadd.f32 %v2465_v34, %v641_v61  ;;  %v1993_v62 = vpop.f32.mrb[54].mxu0  ;;  %1865 = vmatprep.subr.bf16.mxu1 %v777_v55  ;;  %v2157_v61 = vld [vmem:[%s2841_s8] sm:$0xff]  }
 0x149   :  { %v653_v63 = vadd.f32 %v1993_v62, %v2465_v34  ;;  %v644_v0 = vpop.f32.mrb[55].mxu0  ;;  %1866 = vmatpush3.bf16.msra.mxu1 %v2545_v60  ;;  %v742_v42 = vmax.f32 %v650_v58, 0.0  ;;  %v2158_v62 = vld [vmem:[%s2841_s8 + $0x8] sm:$0xff]  }
 0x14a   :  { %v645_v1 = vadd.f32 %v2465_v34, %v644_v0  ;;  %1867 = vmatprep.subr.bf16.mxu1 %v778_v53  ;;  %v740_v3 = vmax.f32 %v642_v43, 0.0  ;;  %v2160_v0 = vld [vmem:[%s2841_s8 + $0x18] sm:$0xff]  }
 0x14b   :  { %v743_v2 = vmax.f32 %v653_v63, 0.0  ;;  %v2159_v63 = vld [vmem:[%s2841_s8 + $0x10] sm:$0xff]  }
 0x14c   :  { %v741_v5 = vmax.f32 %v645_v1, 0.0  ;;  %v2161_v1 = vld [vmem:[%s2841_s8 + $0x20] sm:$0xff]  }
 0x14d   :  { %v780_v6 = vpack.c.bf16 %v743_v2, %v742_v42  ;;  %1868 = vmatpush3.bf16.msra.mxu1 %v2543_v56  ;;  %v2162_v42 = vld [vmem:[%s2841_s8 + $0x28] sm:$0xff]   ;;  %v1012_v2 = vpop.permute.xlu0 %1011 }
 0x14e   :  { %v779_v9 = vpack.c.bf16 %v741_v5, %v740_v3  ;;  %v1996_v10 = vpop.f32.mrb[56].mxu0  ;;  %v2163_v3 = vld [vmem:[%s2841_s8 + $0x30] sm:$0xff]   ;;  %v1009_v5 = vand.u32 127, %v797_v37 }
 0x14f   :  { %v666_v13 = vadd.f32 %v1996_v10, %v2465_v34  ;;  %v657_v14 = vpop.f32.mrb[57].mxu0  ;;  %v2241_v10 = vmov 1.0|1.0  }
 0x150   :  { %v658_v15 = vadd.f32 %v2465_v34, %v657_v14  ;;  %v1997_v16 = vpop.f32.mrb[58].mxu0  ;;  %1869 = vmatprep.subr.bf16.mxu1 %v779_v9  ;;  %v2164_v9 = vld [vmem:[%s2841_s8 + $0x38] sm:$0xff]   ;;  %vm1016_vm2 = vcmp.eq.s32.totalorder %v1009_v5, %v1012_v2 }
 0x151   :  { %v669_v60 = vadd.f32 %v1997_v16, %v2465_v34  ;;  %v660_v17 = vpop.f32.mrb[59].mxu0  ;;  %1870 = vmatpush3.bf16.msra.mxu1 %v2555_v8  ;;  %v746_v59 = vmax.f32 %v666_v13, 0.0 }
 0x152   :  { %v661_v18 = vadd.f32 %v2465_v34, %v660_v17  ;;  %1871 = vmatprep.subr.bf16.mxu1 %v780_v6  ;;  %v744_v56 = vmax.f32 %v658_v15, 0.0  ;;  %v1015_v6 = vpop.permute.xlu0 %1014 }
 0x153   :  { %v747_v19 = vmax.f32 %v669_v60, 0.0  ;;  %vm1017_vm3 = vcmp.eq.s32.totalorder %v1009_v5, %v1015_v6 }
 0x154   :  { %v745_v20 = vmax.f32 %v661_v18, 0.0  ;;  %vm1768_vm4 = vmpackc.low %vm1017_vm3, %vm1016_vm2  ;;  %v2167_v18 = vld [vmem:[%s2842_s9 + $0x4] ss:$16 sps:$4 sm:$0xff]  }
 0x155   :  { %v782_v21 = vpack.c.bf16 %v747_v19, %v746_v59  ;;  %1872 = vmatpush3.bf16.msra.mxu1 %v2553_v7 }
 0x156   :  { %v781_v23 = vpack.c.bf16 %v745_v20, %v744_v56  ;;  %v2000_v24 = vpop.f32.mrb[60].mxu0  ;;  %v1126_v56 = vld [vmem:[%s2836_s3] sm:$0x1] }
 0x157   :  { %v682_v27 = vadd.f32 %v2000_v24, %v2465_v34  ;;  %v673_v28 = vpop.f32.mrb[61].mxu0  ;;  %v2165_v20 = vld [vmem:[%s2842_s9] ss:$16 sps:$4 sm:$0xff]   ;;  %v2173_v24 = vld [vmem:[%s2842_s9 + $0xc] ss:$16 sps:$4 sm:$0xff]  }
 0x158   :  { %v674_v29 = vadd.f32 %v2465_v34, %v673_v28  ;;  %v2001_v30 = vpop.f32.mrb[62].mxu0  ;;  %1873 = vmatprep.subr.bf16.mxu1 %v781_v23  ;;  %v2168_v23 = vld [vmem:[%s2842_s9 + $0x20] ss:$16 sps:$4 sm:$0xff]   ;;  %1281 = vmatprep.subr.bf16.mxu0 %v2173_v24  ;;  %v2176_v28 = vld [vmem:[%s2842_s9 + $0x2c] ss:$16 sps:$4 sm:$0xff]  }
 0x159   :  { %v685_v8 = vadd.f32 %v2001_v30, %v2465_v34  ;;  %v676_v31 = vpop.f32.mrb[63].mxu0  ;;  %1874 = vmatpush3.bf16.msra.mxu1 %v2563_v57  ;;  %v750_v12 = vmax.f32 %v682_v27, 0.0  ;;  %v2239_v57 = vmov 0.0   ;;  %v2171_v27 = vld [vmem:[%s2842_s9 + $0x8] ss:$16 sps:$4 sm:$0xff]  }
 0x15a   :  { %v677_v32 = vadd.f32 %v2465_v34, %v676_v31  ;;  %1875 = vmatprep.subr.bf16.mxu1 %v782_v21  ;;  %v748_v7 = vmax.f32 %v674_v29, 0.0  ;;  %v2149_v34 = vld [vmem:[%s2839_s6] sm:$0xff]   ;;  %1282 = vmatpush1.bf16.msra.mxu0 %v2171_v27  ;;  %v2192_v27 = vld [vmem:[%s2846_s13 + $0x38] sm:$0xff]  }
 0x15b   :  { %v751_v33 = vmax.f32 %v685_v8, 0.0  ;;  %v2170_v21 = vld [vmem:[%s2842_s9 + $0x24] ss:$16 sps:$4 sm:$0xff]   ;;  %1283 = vmatprep.subr.bf16.mxu0 %v2176_v28  ;;  %v1751_v24 = vld [vmem:[%s2840_s7] ss:$0 sm:$0xff] }
 0x15c   :  { %v749_v35 = vmax.f32 %v677_v32, 0.0 }
 0x15d   :  { %v784_v36 = vpack.c.bf16 %v751_v33, %v750_v12  ;;  %1876 = vmatpush3.bf16.msra.mxu1 %v2561_v22  ;;  %v2150_v22 = vld [vmem:[%s2839_s6 + $0x8] sm:$0xff]   ;;  %v2177_v12 = vld [vmem:[%s2844_s11] sm:$0xff]  }
 0x15e   :  { %v783_v39 = vpack.c.bf16 %v749_v35, %v748_v7  ;;  %v2178_v33 = vld [vmem:[%s2844_s11 + $0x8] sm:$0xff]   ;;  %v2179_v7 = vld [vmem:[%s2844_s11 + $0x10] sm:$0xff]   ;;  %v2180_v35 = vld [vmem:[%s2844_s11 + $0x18] sm:$0xff]  }
 0x160   :  { %1877 = vmatprep.subr.bf16.mxu1 %v783_v39  ;;  %v2182_v39 = vld [vmem:[%s2844_s11 + $0x28] sm:$0xff]  }
 0x161   :  { %1878 = vmatpush3.bf16.msra.mxu1 %v2571_v11  ;;  %v2153_v11 = vld [vmem:[%s2839_s6 + $0x20] sm:$0xff]  }
 0x162   :  { %1879 = vmatprep.subr.bf16.mxu1 %v784_v36  ;;  %v2181_v36 = vld [vmem:[%s2844_s11 + $0x20] sm:$0xff]  }
 0x165   :  { %1880 = vmatpush3.bf16.msra.mxu1 %v2569_v38  ;;  %v2152_v38 = vld [vmem:[%s2839_s6 + $0x18] sm:$0xff]  }
 0x166   :  { %2002 = vmatprep.subr.bf16.mxu1 %v2239_v57 }
 0x168   :  { %887 = vmatmul.mubr.bf16.vlgmr.msra.gmra.mrb[0].mxu1 %v808_v41  ;;  %v2183_v41 = vld [vmem:[%s2844_s11 + $0x30] sm:$0xff]  }
 0x169   :  { %2003 = vmatpush3.bf16.msra.mxu1 %v2149_v34  ;;  %2018 = vmatprep.mubr.msk.bf16.mxu1 %vm2240_vm1, %v2239_v57  ;;  %v2184_v34 = vld [vmem:[%s2844_s11 + $0x38] sm:$0xff]  }
 0x16a   :  { %2004 = vmatprep.subr.bf16.mxu1 %v2239_v57 }
 0x16d   :  { %2005 = vmatpush3.bf16.msra.mxu1 %v2150_v22  ;;  %v2193_v22 = vld [vmem:[%s2847_s14] sm:$0xff]  }
 0x16e   :  { %2006 = vmatprep.subr.bf16.mxu1 %v2239_v57 }
 0x171   :  { %2007 = vmatpush3.bf16.msra.mxu1 %v2151_v54  ;;  %v2194_v54 = vld [vmem:[%s2847_s14 + $0x8] sm:$0xff]  }
 0x172   :  { %2008 = vmatprep.subr.bf16.mxu1 %v2239_v57 }
 0x175   :  { %2009 = vmatpush3.bf16.msra.mxu1 %v2152_v38  ;;  %v2195_v38 = vld [vmem:[%s2847_s14 + $0x10] sm:$0xff]  }
 0x176   :  { %2010 = vmatprep.subr.bf16.mxu1 %v2239_v57 }
 0x179   :  { %2011 = vmatpush3.bf16.msra.mxu1 %v2153_v11  ;;  %v2196_v11 = vld [vmem:[%s2847_s14 + $0x18] sm:$0xff]  }
 0x17a   :  { %2012 = vmatprep.subr.bf16.mxu1 %v2239_v57 }
 0x17d   :  { %2013 = vmatpush3.bf16.msra.mxu1 %v2154_v44  ;;  %v2197_v44 = vld [vmem:[%s2847_s14 + $0x20] sm:$0xff]  }
 0x17e   :  { %2014 = vmatprep.subr.bf16.mxu1 %v2239_v57 }
 0x181   :  { %2015 = vmatpush3.bf16.msra.mxu1 %v2155_v45  ;;  %v2198_v45 = vld [vmem:[%s2847_s14 + $0x28] sm:$0xff]  }
 0x182   :  { %2016 = vmatprep.subr.bf16.mxu1 %v2239_v57 }
 0x185   :  { %2017 = vmatpush3.bf16.msra.mxu1 %v2156_v46  ;;  %v2199_v46 = vld [vmem:[%s2847_s14 + $0x30] sm:$0xff]  }
 0x186   :  { %2022 = vmatprep.subr.bf16.mxu1 %v2239_v57 }
 0x1fb   :  { %v1859_v47 = vpop.f32.mrb[64].mxu0 }
 0x1fc   :  { %v1860_v48 = vpop.f32.mrb[65].mxu0 }
 0x1fd   :  { %v1861_v49 = vadd.f32 %v1860_v48, %v1859_v47  ;;  %v1862_v26 = vpop.f32.mrb[66].mxu0  ;;  %v1185_v47 = vsub.s32 0, %v2468_v40  ;;  %v1181_v48 = vld [vmem:[%s2843_s10] sm:$0xf] }
 0x1fe   :  { %v1863_v50 = vpop.f32.mrb[67].mxu0  ;;  %v1193_v26 = vsub.s32 3, %v2468_v40 }
 0x23b   :  { %v1881_v51 = vpop.f32.mrb[0].mxu1 }
 0x23c   :  { %v1882_v52 = vpop.f32.mrb[1].mxu1 }
 0x23d   :  { %v1883_v53 = vadd.f32 %v1882_v52, %v1881_v51  ;;  %v1884_v25 = vpop.f32.mrb[2].mxu1 }
 0x23e   :  { %v1885_v55 = vpop.f32.mrb[3].mxu1 }
 0x23f   :  { %v889_v58 = vadd.f32 %v1883_v53, %v1861_v49  ;;  %v1186_v49 = vrot.slane %v1181_v48, %v1185_v47  ;;  %v1194_v53 = vrot.slane %v1181_v48, %v1193_v26 }
 0x241   :  { %v894_v43 = vpack.c.bf16 %v889_v58, %v889_v58 }
 0x243   :  { %2019 = vmatmul.mubr.bf16.vlgmr.msra.gmra.mrb[4].mxu1 %v894_v43 }
 0x244   :  { %2023 = vmatpush3.bf16.msra.mxu1 %v2157_v61  ;;  %2038 = vmatprep.mubr.msk.bf16.mxu1 %vm2240_vm1, %v2239_v57 }
 0x245   :  { %2024 = vmatprep.subr.bf16.mxu1 %v2239_v57 }
 0x248   :  { %2025 = vmatpush3.bf16.msra.mxu1 %v2158_v62 }
 0x249   :  { %2026 = vmatprep.subr.bf16.mxu1 %v2239_v57 }
 0x24c   :  { %2027 = vmatpush3.bf16.msra.mxu1 %v2159_v63 }
 0x24d   :  { %2028 = vmatprep.subr.bf16.mxu1 %v2239_v57 }
 0x250   :  { %2029 = vmatpush3.bf16.msra.mxu1 %v2160_v0  ;;  %v1189_v0 = vsub.s32 2, %v2468_v40  ;;  %v2185_v40 = vld [vmem:[%s2846_s13] sm:$0xff]  }
 0x251   :  { %2030 = vmatprep.subr.bf16.mxu1 %v2239_v57 }
 0x254   :  { %2031 = vmatpush3.bf16.msra.mxu1 %v2161_v1 }
 0x255   :  { %2032 = vmatprep.subr.bf16.mxu1 %v2239_v57 }
 0x258   :  { %2033 = vmatpush3.bf16.msra.mxu1 %v2162_v42  ;;  %v1190_v42 = vrot.slane %v1181_v48, %v1189_v0 }
 0x259   :  { %2034 = vmatprep.subr.bf16.mxu1 %v2239_v57 }
 0x25c   :  { %2035 = vmatpush3.bf16.msra.mxu1 %v2163_v3 }
 0x25d   :  { %2036 = vmatprep.subr.bf16.mxu1 %v2239_v57 }
 0x260   :  { %2037 = vmatpush3.bf16.msra.mxu1 %v2164_v9 }
 0x261   :  { %2042 = vmatprep.subr.bf16.mxu1 %v2239_v57 }
 0x263   :  { %2039 = vmatmul.mubr.msk.bf16.vlgmr.msra.gmra.mrb[8].mxu1 %vm1768_vm4, %v2241_v10 }
 0x264   :  { %2044 = vmatprep.mubr.msk.bf16.mxu1 %vm2240_vm1, %v2239_v57 }
 0x316   :  { %v2671_v37 = vpop.f32.mrb[4].mxu1 }
 0x317   :  { %v2020_v13 = vpop.f32.mrb[5].mxu1  ;;  %v1001_v28 = vadd.f32 %v1751_v24, %v2671_v37 }
 0x318   :  { %v1003_v14 = vpop.f32.mrb[6].mxu1 }
 0x319   :  { %v2021_v15 = vpop.f32.mrb[7].mxu1 }
 0x336   :  { %v1119_v16 = vpop.f32.mrb[8].mxu1 }
 0x337   :  { %v2040_v60 = vpop.f32.mrb[9].mxu1 }
 0x338   :  { %v1122_v17 = vpop.f32.mrb[10].mxu1 }
 0x339   :  { %v1127_v59 = vpack.c.bf16 %v1122_v17, %v1119_v16  ;;  %v2041_v19 = vpop.f32.mrb[11].mxu1 }
 0x33a   :  { %v2187_v19 = vld [vmem:[%s2846_s13 + $0x10] sm:$0xff]  }
 0x33b   :  { %2043 = vmatpush3.bf16.msra.mxu1 %v1127_v59  ;;  %v2186_v59 = vld [vmem:[%s2846_s13 + $0x8] sm:$0xff]  }
 0x33c   :  { %1241 = vmatprep.subr.bf16.mxu1 %v2167_v18 }
 0x33e   :  { %2045 = vmatmul.mubr.msk.bf16.vlgmr.msra.gmra.mrb[12].mxu1 %vm1128_vm5, %v1126_v56  ;;  %v2188_v56 = vld [vmem:[%s2846_s13 + $0x18] sm:$0xff]  }
 0x33f   :  { %1242 = vmatpush1.bf16.msra.mxu1 %v2165_v20  ;;  %1273 = vmatprep.mubr.bf16.mxu1 %v2238_v4  ;;  %v2174_v4 = vld [vmem:[%s2842_s9 + $0x28] ss:$16 sps:$4 sm:$0xff]   ;;  %v2189_v20 = vld [vmem:[%s2846_s13 + $0x20] sm:$0xff]  }
 0x340   :  { %1243 = vmatprep.subr.bf16.mxu1 %v2170_v21  ;;  %1284 = vmatpush1.bf16.msra.mxu0 %v2174_v4  ;;  %v2190_v21 = vld [vmem:[%s2846_s13 + $0x28] sm:$0xff]   ;;  %v1450_v4 = vpack.c.bf16 %v1001_v28, %v1001_v28 }
 0x341   :  { %2068 = vmatprep.subr.bf16.mxu0 %v2239_v57 }
 0x343   :  { %1244 = vmatpush1.bf16.msra.mxu1 %v2168_v23  ;;  %v2191_v23 = vld [vmem:[%s2846_s13 + $0x30] sm:$0xff]  }
 0x344   :  { %2048 = vmatprep.subr.bf16.mxu1 %v2239_v57 }
 0x411   :  { %v1166_v29 = vpop.f32.mrb[12].mxu1 }
 0x412   :  { %v1172_v30 = vpack.c.bf16 %v1166_v29, %v1166_v29  ;;  %v2046_v8 = vpop.f32.mrb[13].mxu1  ;;  %v2200_v29 = vld [vmem:[%s2847_s14 + $0x38] sm:$0xff]   ;;  %s2242_s14 = smov [#allocation2]  }
 0x413   :  { %v1169_v31 = vpop.f32.mrb[14].mxu1  ;;  %s1675_s8 = sshll.u32 %s2242_s14, 4  ;;  %s1676_s8 = int_to_ptr.vmem [resolvable:$true] %s1675_s8 }
 0x414   :  { %1779 = vmatmul.mubr.msk.bf16.vlgmr.msra.gmra.mrb[16].mxu1 %vm302_vm0, %v1172_v30  ;;  %1780 = vmatmul.mubr.msk.bf16.vlgmr.msra.gmra.mrb[68].mxu0 %vm302_vm0, %v1172_v30  ;;  %v2047_v32 = vpop.f32.mrb[15].mxu1  ;;  %v1783_v30 = vld [vmem:[%s2845_s12] ss:$0 sm:$0xff]  ;;  %s2213_s12 = scalar_lea.vmem %s1676_s8, 32  ;;  %p2218_p1 = scmp.lt.s32.totalorder %s1676_s8, %s1676_s8 }
 0x415   :  { %2064 = vmatprep.mubr.msk.bf16.mxu1 %vm2240_vm1, %v2239_v57  ;;  %2084 = vmatprep.mubr.msk.bf16.mxu0 %vm2240_vm1, %v2239_v57  ;;  %p2214_p0 = scmp.ne.s32.totalorder %s1676_s8, %s2213_s12  ;;  %p2219_p2 = scmp.lt.s32.totalorder %s2213_s12, %s2213_s12 }
 0x416   :  { %2049 = vmatpush3.bf16.msra.mxu1 %v2177_v12  ;;  %2069 = vmatpush3.bf16.msra.mxu0 %v2193_v22 }
 0x417   :  { %2050 = vmatprep.subr.bf16.mxu1 %v2239_v57  ;;  %2070 = vmatprep.subr.bf16.mxu0 %v2239_v57  ;;  %p2220_p3 = por %p2219_p2, %p2218_p1 }
 0x419   :  { %p2221_p4 = pnand %p2220_p3, %p2214_p0 }
 0x41a   :  { %2051 = vmatpush3.bf16.msra.mxu1 %v2178_v33  ;;  %2071 = vmatpush3.bf16.msra.mxu0 %v2194_v54 }
 0x41b   :  { %2052 = vmatprep.subr.bf16.mxu1 %v2239_v57  ;;  %2072 = vmatprep.subr.bf16.mxu0 %v2239_v57 }
 0x41e   :  { %2053 = vmatpush3.bf16.msra.mxu1 %v2179_v7  ;;  %2073 = vmatpush3.bf16.msra.mxu0 %v2195_v38 }
 0x41f   :  { %2054 = vmatprep.subr.bf16.mxu1 %v2239_v57  ;;  %2074 = vmatprep.subr.bf16.mxu0 %v2239_v57 }
 0x422   :  { %2055 = vmatpush3.bf16.msra.mxu1 %v2180_v35  ;;  %2075 = vmatpush3.bf16.msra.mxu0 %v2196_v11 }
 0x423   :  { %2056 = vmatprep.subr.bf16.mxu1 %v2239_v57  ;;  %2076 = vmatprep.subr.bf16.mxu0 %v2239_v57 }
 0x426   :  { %2057 = vmatpush3.bf16.msra.mxu1 %v2181_v36  ;;  %2077 = vmatpush3.bf16.msra.mxu0 %v2197_v44 }
 0x427   :  { %2058 = vmatprep.subr.bf16.mxu1 %v2239_v57  ;;  %2078 = vmatprep.subr.bf16.mxu0 %v2239_v57 }
 0x42a   :  { %2059 = vmatpush3.bf16.msra.mxu1 %v2182_v39  ;;  %2079 = vmatpush3.bf16.msra.mxu0 %v2198_v45 }
 0x42b   :  { %2060 = vmatprep.subr.bf16.mxu1 %v2239_v57  ;;  %2080 = vmatprep.subr.bf16.mxu0 %v2239_v57 }
 0x42e   :  { %2061 = vmatpush3.bf16.msra.mxu1 %v2183_v41  ;;  %2081 = vmatpush3.bf16.msra.mxu0 %v2199_v46  ;;  %v1808_v41 = vld [vmem:[%s2848_s15] ss:$0 sm:$0xff] }
 0x42f   :  { %2062 = vmatprep.subr.bf16.mxu1 %v2239_v57  ;;  %2082 = vmatprep.subr.bf16.mxu0 %v2239_v57 }
 0x432   :  { %2063 = vmatpush3.bf16.msra.mxu1 %v2184_v34  ;;  %2083 = vmatpush3.bf16.msra.mxu0 %v2200_v29 }
 0x433   :  { %2088 = vmatprep.subr.bf16.mxu1 %v2239_v57 }
 0x4e7   :  { %v1275_v50 = vpop.f32.mrb[16].mxu1  ;;  %v1315_v51 = vpop.f32.mrb[68].mxu0 }
 0x4e8   :  { %v1276_v52 = vadd.f32 %v1275_v50, %v1186_v49  ;;  %v1317_v25 = vpop.f32.mrb[69].mxu0  ;;  %v1277_v55 = vpop.f32.mrb[17].mxu1  ;;  %v1316_v3 = vadd.f32 %v1315_v51, %v1190_v42 }
 0x4e9   :  { %v1278_v58 = vpop.f32.mrb[18].mxu1  ;;  %v1319_v61 = vpop.f32.mrb[70].mxu0  ;;  %v1318_v1 = vadd.f32 %v1317_v25, %v1194_v53 }
 0x4ea   :  { %v1781_v43 = vmul.f32 -1.442695, %v1276_v52  ;;  %v1279_v62 = vpop.f32.mrb[19].mxu1  ;;  %v1320_v63 = vpop.f32.mrb[71].mxu0 }
 0x4eb   :  { %v1782_v2 = vmul.f32 -1.442695, %v1318_v1 }
 0x4ec   :  { %2201 = vpow2.f32 %v1781_v43 }
 0x4ed   :  { %2203 = vpow2.f32 %v1782_v2 }
 0x4ee   :  { %2205 = vtanh.f32 %v1316_v3 }
 0x4f6   :  { %v2202_v5 = vpop.eup %2201 }
 0x4f7   :  { %v1325_v6 = vadd.f32 1.0, %v2202_v5  ;;  %v2204_v9 = vpop.eup %2203 }
 0x4f8   :  { %v1332_v10 = vadd.f32 1.0, %v2204_v9  ;;  %v2206_v13 = vpop.eup %2205 }
 0x4f9   :  { %2207 = vrcp.f32 %v1325_v6 }
 0x4fa   :  { %2209 = vrcp.f32 %v1332_v10 }
 0x503   :  { %v2208_v14 = vpop.eup %2207 }
 0x504   :  { %v1335_v15 = vmul.f32 %v2208_v14, %v2206_v13  ;;  %v2210_v16 = vpop.eup %2209 }
 0x506   :  { %2211 = vtanh.f32 %v1335_v15 }
 0x510   :  { %v2212_v60 = vpop.eup %2211 }
 0x511   :  { %v1337_v17 = vmul.f32 %v2212_v60, %v2210_v16 }
 0x513   :  { %v1338_v18 = vpack.c.bf16 %v1337_v17, %v1337_v17 }
 0x515   :  { %2065 = vmatmul.mubr.bf16.vlgmr.msra.gmra.mrb[20].mxu1 %v1338_v18 }
 0x516   :  { %2089 = vmatpush3.bf16.msra.mxu1 %v2185_v40  ;;  %2104 = vmatprep.mubr.msk.bf16.mxu1 %vm2240_vm1, %v2239_v57 }
 0x517   :  { %2090 = vmatprep.subr.bf16.mxu1 %v2239_v57 }
 0x51a   :  { %2091 = vmatpush3.bf16.msra.mxu1 %v2186_v59 }
 0x51b   :  { %2092 = vmatprep.subr.bf16.mxu1 %v2239_v57 }
 0x51e   :  { %2093 = vmatpush3.bf16.msra.mxu1 %v2187_v19 }
 0x51f   :  { %2094 = vmatprep.subr.bf16.mxu1 %v2239_v57 }
 0x522   :  { %2095 = vmatpush3.bf16.msra.mxu1 %v2188_v56 }
 0x523   :  { %2096 = vmatprep.subr.bf16.mxu1 %v2239_v57 }
 0x526   :  { %2097 = vmatpush3.bf16.msra.mxu1 %v2189_v20 }
 0x527   :  { %2098 = vmatprep.subr.bf16.mxu1 %v2239_v57 }
 0x52a   :  { %2099 = vmatpush3.bf16.msra.mxu1 %v2190_v21 }
 0x52b   :  { %2100 = vmatprep.subr.bf16.mxu1 %v2239_v57 }
 0x52e   :  { %2101 = vmatpush3.bf16.msra.mxu1 %v2191_v23 }
 0x52f   :  { %2102 = vmatprep.subr.bf16.mxu1 %v2239_v57 }
 0x532   :  { %2103 = vmatpush3.bf16.msra.mxu1 %v2192_v27 }
 0x535   :  { %2105 = vmatmul.mubr.bf16.vlgmr.msra.gmra.mrb[24].mxu1 %v1450_v4 }
 0x5e8   :  { %v1444_v8 = vpop.f32.mrb[20].mxu1 }
 0x5e9   :  { %v1445_v31 = vadd.f32 %v1783_v30, %v1444_v8  ;;  %v2066_v32 = vpop.f32.mrb[21].mxu1 }
 0x5ea   :  { %v1447_v12 = vpop.f32.mrb[22].mxu1 }
 0x5eb   :  { %v1467_v33 = vpack.c.bf16 %v1445_v31, %v1445_v31  ;;  %v2067_v37 = vpop.f32.mrb[23].mxu1 }
 0x5ed   :  { %2085 = vmatmul.mubr.bf16.vlgmr.msra.gmra.mrb[72].mxu0 %v1467_v33 }
 0x608   :  { %v1654_v57 = vpop.f32.mrb[24].mxu1 }
 0x609   :  { %v2106_v7 = vpop.f32.mrb[25].mxu1 }
 0x60a   :  { %v1657_v35 = vpop.f32.mrb[26].mxu1 }
 0x60b   :  { %v2107_v36 = vpop.f32.mrb[27].mxu1 }
 0x6c0   :  { %v1566_v39 = vpop.f32.mrb[72].mxu0 }
 0x6c1   :  { %v1655_v34 = vadd.f32 %v1654_v57, %v1566_v39  ;;  %v2086_v22 = vpop.f32.mrb[73].mxu0 }
 0x6c2   :  { %v1569_v54 = vpop.f32.mrb[74].mxu0 }
 0x6c3   :  { %v2087_v38 = vpop.f32.mrb[75].mxu0  ;;  %v1667_v11 = vadd.f32 %v1808_v41, %v1655_v34 }
 0x6c5   :  { %1668 = vst [vmem:[#allocation2] sm:$0x3] %v1667_v11 }
 0x6c6   :  { %2224 = shalt.err (!%p2221_p4)
}
 0x6c7   :  { %s2225_s15 = scalar_lea.hbm %s2849_s16, 32 }
 0x6c8   :  { %p2226_p5 = scmp.ne.s32.totalorder %s2849_s16, %s2225_s15  ;;  %p2229_p6 = scmp.lt.u32.totalorder %s2225_s15, %s2849_s16 }
 0x6ca   :  { %p2231_p7 = pnand %p2229_p6, %p2226_p5 }
 0x6cc   :  { %2234 = shalt.err (!%p2231_p7)
}
 0x6cd   :  { %1678 = dma.vmem_to_hbm [thread:$0]  %s1676_s8, 32, %s2849_s16, [#allocation3]  }
 0x6ce   :  { %2235 = dma.done.wait [#allocation3], 32  }
 0x6cf   :  { %2236 = vsyncadd [#allocation3], 4294967264 }
 0x6d0   :  { %1682 = vsyncpa [#allocation3], 1 }

</bundles_post_ra>
